<compile_context>
chip_gen: v7x
topology: tpu7x:2x2x1
jax: 0.10.0
libtpu: 0.0.40
codegen_flags: <defaults>
</compile_context>

<pallas_src>
import jax
import jax.numpy as jnp
from jax.experimental import pallas as pl
from jax.experimental.pallas import tpu as pltpu


# ----------------------------------------------------------------------------
# Hardware / tiling helpers
# ----------------------------------------------------------------------------
def _vmem_capacity_bytes():
    try:
        return int(pltpu.get_tpu_info().vmem_capacity_bytes)
    except Exception:
        return 64 * 1024 * 1024          # conservative default (v7x per-core VMEM)


def _auto_compute_dtype(N, M):
    """bf16 inputs only in the MXU-bound regime on bf16-native chips (v6e/v7x);
    f32 otherwise (v5e has no bf16 VPU; small problems keep tight tolerance)."""
    try:
        kind = jax.devices()[0].device_kind.lower()
    except Exception:
        kind = ""
    if N * max(M, 1) >= 512 * 256 and ("v6" in kind or "v7" in kind):
        return jnp.bfloat16
    return jnp.float32


def _choose_bh_tile(BH, per_row_bytes, fixed_bytes, budget, max_tile=1024):
    """Largest multiple-of-8 divisor of BH whose per-grid-step footprint fits
    the VMEM budget; prefers >= 2 grid steps (v7x dual-TC sharding + DMA
    pipelining)."""
    if BH <= 8 or BH % 8 != 0:
        return BH                                    # single block == full dim
    cands = [c for c in range(8, min(BH, max_tile) + 1, 8) if BH % c == 0]
    if not cands:
        return BH
    multi = [c for c in cands if c <= BH // 2]       # keep at least 2 grid steps
    if multi:
        cands = multi
    fit = [c for c in cands if fixed_bytes + c * per_row_bytes <= budget]
    return max(fit) if fit else min(cands)


# ----------------------------------------------------------------------------
# Path A: fully pre-contracted (E*N, O*N) matrix -> one MXU matmul per tile
# ----------------------------------------------------------------------------
def _fused_kernel(x_ref, w_ref, o_ref):
    o_ref[...] = jnp.dot(x_ref[...], w_ref[...],
                         preferred_element_type=jnp.float32).astype(o_ref.dtype)


def _build_fused_matrix(w_real, w_imag, E, O, N, M, dtype):
    """W[(e,n'),(o,n)] = sum_m s_m * Re( e^{-i2pi n'm/N} w[e,o,m] e^{+i2pi mn/N} ),
    s_0 = 1/N, s_{m>=1} = 2/N  (exact rfft->mix->irfft contraction)."""
    m = jnp.arange(M, dtype=jnp.float32)
    n = jnp.arange(N, dtype=jnp.float32)
    w_c = (w_real.astype(jnp.float32)
           + 1j * w_imag.astype(jnp.float32)).astype(jnp.complex64)
    scale = (jnp.where(m == 0, 1.0, 2.0) / N).astype(jnp.float32)
    fwd = jnp.exp(-2j * jnp.pi / N * jnp.outer(n, m)).astype(jnp.complex64)  # (N, M)
    inv = jnp.exp(2j * jnp.pi / N * jnp.outer(m, n)).astype(jnp.complex64)   # (M, N)
    w_s = w_c * scale[None, None, :]
    wmat = jnp.einsum('pm,eom,mn->epon', fwd, w_s, inv).real                 # (E,N,O,N)
    return wmat.reshape(E * N, O * N).astype(dtype)


def _run_fused(x2d, wfull, BH, E, N, O, bh_tile, compute_dtype, budget, vmem_limit):
    isz = jnp.dtype(compute_dtype).itemsize
    fixed = 2 * (E * N) * (O * N) * isz               # W (double-buffered copy charged)
    per_row = 2 * (E * N * isz + O * N * 4)           # x / out blocks, double-buffered
    if bh_tile is None:
        bh_tile = _choose_bh_tile(BH, per_row, fixed, budget)
    assert BH % bh_tile == 0
    grid = (BH // bh_tile,)

    flops = 2 * BH * (E * N) * (O * N)
    bytes_accessed = (BH * E * N * isz + BH * O * N * 4
                      + (BH // bh_tile) * (E * N) * (O * N) * isz)

    return pl.pallas_call(
        _fused_kernel,
        out_shape=jax.ShapeDtypeStruct((BH, O * N), jnp.float32),
        grid=grid,
        in_specs=[
            pl.BlockSpec((bh_tile, E * N), lambda i: (i, 0)),
            pl.BlockSpec((E * N, O * N), lambda i: (0, 0)),
        ],
        out_specs=pl.BlockSpec((bh_tile, O * N), lambda i: (i, 0)),
        compiler_params=pltpu.CompilerParams(
            dimension_semantics=("parallel",),
            vmem_limit_bytes=int(vmem_limit)),
        cost_estimate=pl.CostEstimate(flops=int(flops), transcendentals=0,
                                      bytes_accessed=int(bytes_accessed)),
    )(x2d, wfull)


# ----------------------------------------------------------------------------
# Path B: DFT -> per-mode complex channel mix -> IDFT, mode-chunked grid axis
# ----------------------------------------------------------------------------
def _make_dft_kernel(E, O, N, MC):
    def kernel(x_ref, cm_ref, wr_ref, wi_ref, im_ref, o_ref):
        # x_ref : (bh_tile, E*N)     time-domain input slab
        # cm_ref: (N, 2*MC)          [cos | -sin] forward DFT chunk
        # wr_ref, wi_ref: (E*O, MC)  complex mixing weights, modes on lanes
        # im_ref: (2*MC, N)          [ir ; ii] inverse DFT chunk
        # o_ref : (bh_tile, O*N)     accumulated across the mode-chunk grid axis
        k = pl.program_id(1)

        @pl.when(k == 0)
        def _():
            o_ref[...] = jnp.zeros_like(o_ref)

        xb = x_ref[...]
        cm = cm_ref[...]
        wr = wr_ref[...]
        wi = wi_ref[...]
        im = im_ref[...]

        # Forward DFT of this mode chunk: one (bh, N) @ (N, 2*MC) dot per channel.
        F = []
        for e in range(E):
            xe = xb[:, e * N:(e + 1) * N]
            F.append(jnp.dot(xe, cm, preferred_element_type=jnp.float32))

        # Per-mode complex channel mix on the VPU (broadcast over sublanes),
        # then inverse DFT contribution of this chunk: one dot per out-channel.
        y_parts = []
        for o in range(O):
            gr = None
            gi = None
            for e in range(E):
                fr = F[e][:, :MC]
                fi = F[e][:, MC:]
                row = e * O + o
                wre = wr[row:row + 1, :]
                wie = wi[row:row + 1, :]
                tr = fr * wre - fi * wie
                ti = fr * wie + fi * wre
                gr = tr if gr is None else gr + tr
                gi = ti if gi is None else gi + ti
            g = jnp.concatenate([gr, gi], axis=-1).astype(im.dtype)
            y_parts.append(jnp.dot(g, im, preferred_element_type=jnp.float32))

        o_ref[...] += jnp.concatenate(y_parts, axis=-1)

    return kernel


def _run_dft(x2d, w_real, w_imag, BH, E, N, O, M, bh_tile, compute_dtype,
             budget, vmem_limit):
    isz = jnp.dtype(compute_dtype).itemsize
    MP = ((M + 127) // 128) * 128                     # lane-pad the mode axis
    if MP <= 512:
        MC = MP
    elif MP % 512 == 0:
        MC = 512
    elif MP % 256 == 0:
        MC = 256
    else:
        MC = 128
    n_chunks = MP // MC

    # Forward / inverse real-DFT matrices (replace rfft / irfft).
    n_idx = jnp.arange(N, dtype=jnp.float32)[:, None]
    m_idx = jnp.arange(MP, dtype=jnp.float32)[None, :]
    ang = (2.0 * jnp.pi / N) * n_idx * m_idx          # (N, MP)
    cos_f = jnp.cos(ang)
    msin_f = -jnp.sin(ang)
    # irfft(n=N) with nonzero bins only in 0..M-1 (< N/2):
    #   y[n] = (1/N) Re(F0) + (2/N) sum_{m>=1} (Re(Fm) cos - Im(Fm) sin)
    s = (jnp.where(jnp.arange(MP) == 0, 1.0, 2.0) / N).astype(jnp.float32)[:, None]
    ir = s * cos_f.T                                  # (MP, N)
    ii = s * msin_f.T                                 # (MP, N)

    # Chunk constants along modes -> leading grid ('k') axis of their arrays.
    cm = jnp.transpose(
        jnp.concatenate([cos_f.reshape(N, n_chunks, MC),
                         msin_f.reshape(N, n_chunks, MC)], axis=-1),
        (1, 0, 2)).astype(compute_dtype)              # (nc, N, 2*MC)
    im = jnp.concatenate([ir.reshape(n_chunks, MC, N),
                          ii.reshape(n_chunks, MC, N)],
                         axis=1).astype(compute_dtype)  # (nc, 2*MC, N)
    wr = jnp.pad(w_real.astype(jnp.float32), ((0, 0), (0, 0), (0, MP - M))
                 ).reshape(E * O, n_chunks, MC).transpose(1, 0, 2)  # (nc, E*O, MC)
    wi = jnp.pad(w_imag.astype(jnp.float32), ((0, 0), (0, 0), (0, MP - M))
                 ).reshape(E * O, n_chunks, MC).transpose(1, 0, 2)

    # VMEM budget: double-buffered operand chunks + live f32 intermediates.
    fixed = 2 * (N * 2 * MC * isz + 2 * MC * N * isz + 2 * E * O * MC * 4)
    per_row = (2 * (E * N * isz + O * N * 4)
               + 4 * ((2 * E + 4) * MC + O * N))
    if bh_tile is None:
        bh_tile = _choose_bh_tile(BH, per_row, fixed, budget)
    assert BH % bh_tile == 0
    grid = (BH // bh_tile, n_chunks)

    flops = BH * (4 * (E + O) * N * MP + 8 * E * O * MP)
    bytes_accessed = (BH * E * N * isz + BH * O * N * 4
                      + (BH // bh_tile) * (4 * N * MP * isz + 2 * E * O * MP * 4))

    kernel = _make_dft_kernel(E, O, N, MC)
    return pl.pallas_call(
        kernel,
        out_shape=jax.ShapeDtypeStruct((BH, O * N), jnp.float32),
        grid=grid,
        in_specs=[
            pl.BlockSpec((bh_tile, E * N), lambda i, k: (i, 0)),
            pl.BlockSpec((None, N, 2 * MC), lambda i, k: (k, 0, 0)),
            pl.BlockSpec((None, E * O, MC), lambda i, k: (k, 0, 0)),
            pl.BlockSpec((None, E * O, MC), lambda i, k: (k, 0, 0)),
            pl.BlockSpec((None, 2 * MC, N), lambda i, k: (k, 0, 0)),
        ],
        out_specs=pl.BlockSpec((bh_tile, O * N), lambda i, k: (i, 0)),
        compiler_params=pltpu.CompilerParams(
            dimension_semantics=("parallel", "arbitrary"),
            vmem_limit_bytes=int(vmem_limit)),
        cost_estimate=pl.CostEstimate(flops=int(flops), transcendentals=0,
                                      bytes_accessed=int(bytes_accessed)),
    )(x2d, cm, wr, wi, im)


# ----------------------------------------------------------------------------
# Public wrapper
# ----------------------------------------------------------------------------
def spectral_conv1d(x, w_real, w_imag, modes2, out_channels,
                    bh_tile=None, compute_dtype=None, force_path=None):
    """x: (B, H, E, N); w_real/w_imag: (E, O, modes2). Returns (B, H, O, N) f32."""
    B, H, E, N = x.shape
    M = int(modes2)
    O = int(out_channels)
    assert M <= N // 2, "module guarantees modes2 <= seq_len // 2"
    BH = B * H

    vmem_cap = _vmem_capacity_bytes()
    budget = int(0.70 * vmem_cap)                      # tiling budget (headroom kept)
    vmem_limit = min(int(0.85 * vmem_cap), 112 * 1024 * 1024)

    if compute_dtype is None:
        compute_dtype = _auto_compute_dtype(N, M)
    isz = jnp.dtype(compute_dtype).itemsize

    # Free reshape (no transpose / HBM round trip): columns are (e, n') pairs.
    x2d = x.reshape(BH, E * N).astype(compute_dtype)

    fused_bytes = 2 * (E * N) * (O * N) * isz          # resident fused matrix (2 bufs)
    use_fused = fused_bytes <= 0.35 * budget
    if force_path == "fused":
        use_fused = True
    elif force_path == "dft":
        use_fused = False

    if use_fused:
        wfull = _build_fused_matrix(w_real, w_imag, E, O, N, M, compute_dtype)
        out2d = _run_fused(x2d, wfull, BH, E, N, O, bh_tile, compute_dtype,
                           budget, vmem_limit)
    else:
        out2d = _run_dft(x2d, w_real, w_imag, BH, E, N, O, M, bh_tile,
                         compute_dtype, budget, vmem_limit)

    return out2d.reshape(B, H, O, N)                   # free reshape


# ----------------------------------------------------------------------------
# Pure-JAX reference (rfft -> einsum -> irfft), mirrors the PyTorch forward.
# ----------------------------------------------------------------------------
def reference(x, w_real, w_imag, modes2, out_channels):
    B, H, E, N = x.shape
    x_ft = jnp.fft.rfft(x.astype(jnp.float32), axis=-1)
    w = (w_real + 1j * w_imag).astype(jnp.complex64)
    a = x_ft[..., :modes2]
    out_modes = jnp.einsum('bjix,iox->bjox', a, w)
    n_freq = N // 2 + 1
    out_ft = jnp.pad(out_modes, ((0, 0), (0, 0), (0, 0), (0, n_freq - modes2)))
    return jnp.fft.irfft(out_ft, n=N, axis=-1).astype(jnp.float32)


if __name__ == "__main__":
    # Module config (compression=0, mode_type=0).
    in_channels = 4
    out_channels = 4
    seq_len = 16
    modes1 = 8
    modes2 = min(modes1, seq_len // 2)
    B, H = 2, 4

    key = jax.random.PRNGKey(0)
    kx, kwr, kwi = jax.random.split(key, 3)

    x = jax.random.normal(kx, (B, H, in_channels, seq_len), dtype=jnp.float32)
    scale = 1.0 / (in_channels * out_channels)
    w_real = scale * jax.random.uniform(
        kwr, (in_channels, out_channels, modes2), dtype=jnp.float32)
    w_imag = scale * jax.random.uniform(
        kwi, (in_channels, out_channels, modes2), dtype=jnp.float32)

    y_ref = reference(x, w_real, w_imag, modes2, out_channels)

    # Path A (single fused-matrix matmul) — auto-selected at this small config.
    y = jax.block_until_ready(
        spectral_conv1d(x, w_real, w_imag, modes2, out_channels))
    assert y.shape == (B, H, out_channels, seq_len)
    err_a = float(jnp.max(jnp.abs(y - y_ref)))
    assert err_a < 1e-4, f"fused path mismatch vs reference (max abs err {err_a})"

    # Path B (DFT -> mix -> IDFT with mode-chunked grid) — exercised explicitly.
    y2 = jax.block_until_ready(
        spectral_conv1d(x, w_real, w_imag, modes2, out_channels,
                        force_path="dft", compute_dtype=jnp.float32))
    err_b = float(jnp.max(jnp.abs(y2 - y_ref)))
    assert err_b < 1e-4, f"dft path mismatch vs reference (max abs err {err_b})"

    print("KERNEL_OK")
</pallas_src>

<mosaic_0001>
module attributes {stable_mosaic.version = 11 : i64} {
  func.func @_fused_kernel(%arg0: i32, %arg1: memref<8x64xf32, #tpu.memory_space<vmem>>, %arg2: memref<64x64xf32, #tpu.memory_space<vmem>>, %arg3: memref<8x64xf32, #tpu.memory_space<vmem>>) attributes {dimension_semantics = [#tpu.dimension_semantics<parallel>], iteration_bounds = array<i64: 1>, scalar_prefetch = 0 : i64, scratch_operands = 0 : i64, tpu.core_type = #tpu.core_type<tc>, window_params = [{transform_indices = @transform_0, window_bounds = array<i64: 8, 64>}, {pipeline_mode = #tpu.pipeline_mode<synchronous>, transform_indices = @transform_1, window_bounds = array<i64: 64, 64>}, {transform_indices = @transform_2, window_bounds = array<i64: 8, 64>}]} {
    %c0 = arith.constant 0 : index
    %c0_0 = arith.constant 0 : index
    %0 = vector.load %arg1[%c0, %c0_0] : memref<8x64xf32, #tpu.memory_space<vmem>>, vector<8x64xf32>
    %c0_1 = arith.constant 0 : index
    %c0_2 = arith.constant 0 : index
    %1 = vector.load %arg2[%c0_1, %c0_2] : memref<64x64xf32, #tpu.memory_space<vmem>>, vector<64x64xf32>
    %cst = arith.constant dense<0.000000e+00> : vector<8x64xf32>
    %2 = tpu.matmul %0, %1, %cst {dimension_numbers = #tpu.dot_dimension_numbers<[1], [0], [0], [1], [0, 0, 1, 1], [], []>} : vector<8x64xf32>, vector<64x64xf32>, vector<8x64xf32> -> vector<8x64xf32>
    %c0_3 = arith.constant 0 : index
    %c0_4 = arith.constant 0 : index
    %3 = vector.load %arg3[%c0_3, %c0_4] : memref<8x64xf32, #tpu.memory_space<vmem>>, vector<8x64xf32>
    tpu.vector_store %arg3[%c0_3, %c0_4], %2 {strides = array<i32>} : memref<8x64xf32, #tpu.memory_space<vmem>>, vector<8x64xf32>,
    return
  }
  func.func @transform_0(%arg0: i32) -> (i32, i32) {
    %c0_i32 = arith.constant 0 : i32
    %c0_i32_0 = arith.constant 0 : i32
    return %arg0, %c0_i32 : i32, i32
  }
  func.func @transform_1(%arg0: i32) -> (i32, i32) {
    %c0_i32 = arith.constant 0 : i32
    %c0_i32_0 = arith.constant 0 : i32
    %c0_i32_1 = arith.constant 0 : i32
    return %c0_i32, %c0_i32_0 : i32, i32
  }
  func.func @transform_2(%arg0: i32) -> (i32, i32) {
    %c0_i32 = arith.constant 0 : i32
    %c0_i32_0 = arith.constant 0 : i32
    return %arg0, %c0_i32 : i32, i32
  }
}

</mosaic_0001>

<bundles_post_ra>
// kernel: tpu_custom_call.1
= control target key start
LH: loop header
LB: loop body
LE: loop exit
PB: predicated region body
PF: predicated region fallthrough
CT: control target
= control target key end

     0   :  { %7 = vsyncpa [#allocation3], 0  ;;  %s325_s0 = inlined_call_operand.hbm [shape: f32[8,64], index: 0, kind: input, shape index: {}]   ;;  %s326_s1 = inlined_call_operand.hbm [shape: f32[64,64], index: 1, kind: input, shape index: {}]   ;;  %s327_s2 = inlined_call_operand.hbm [shape: f32[8,64], index: 2, kind: output, shape index: {}]  }
   0x1   :  { %8 = vsyncpa [#allocation6], 0 }
   0x2   :  { %9 = vsyncpa [#allocation4], 0  ;;  %s259_s9 = smov [#allocation2]   ;;  %s260_s11 = smov [#allocation5]  }
   0x3   :  { %s16_s10 = sshll.u32 %s259_s9, 4  ;;  %s25_s12 = sshll.u32 %s260_s11, 4  ;;  %s17_s10 = int_to_ptr.vmem [resolvable:$true] %s16_s10  ;;  %s282_s12 = int_to_ptr.vmem [resolvable:$true] %s25_s12 }
   0x4   :  { %s187_s15 = scalar_lea.hbm %s325_s0, 128 }
   0x5   :  { %p188_p0 = scmp.ne.s32.totalorder %s325_s0, %s187_s15  ;;  %p191_p1 = scmp.lt.u32.totalorder %s187_s15, %s325_s0 }
   0x7   :  { %p193_p2 = pnand %p191_p1, %p188_p0 }
   0x9   :  { %196 = shalt.err (!%p193_p2)
}
   0xa   :  { %s197_s20 = scalar_lea.vmem %s17_s10, 128  ;;  %p202_p4 = scmp.lt.s32.totalorder %s17_s10, %s17_s10 }
   0xb   :  { %p198_p3 = scmp.ne.s32.totalorder %s17_s10, %s197_s20  ;;  %p203_p5 = scmp.lt.s32.totalorder %s197_s20, %s197_s20 }
   0xd   :  { %p204_p6 = por %p203_p5, %p202_p4 }
   0xf   :  { %p205_p7 = pnand %p204_p6, %p198_p3 }
  0x11   :  { %208 = shalt.err (!%p205_p7)
}
  0x12   :  { %19 = dma.hbm_to_vmem [thread:$0]  %s325_s0, 128, %s17_s10, [#allocation3]  }
  0x13   :  { %s209_s25 = scalar_lea.hbm %s326_s1, 1024 }
  0x14   :  { %p210_p8 = scmp.ne.s32.totalorder %s326_s1, %s209_s25  ;;  %p213_p9 = scmp.lt.u32.totalorder %s209_s25, %s326_s1 }
  0x16   :  { %p215_p10 = pnand %p213_p9, %p210_p8 }
  0x18   :  { %218 = shalt.err (!%p215_p10)
}
  0x19   :  { %s219_s30 = scalar_lea.vmem %s282_s12, 1024  ;;  %p224_p12 = scmp.lt.s32.totalorder %s282_s12, %s282_s12 }
  0x1a   :  { %p220_p11 = scmp.ne.s32.totalorder %s282_s12, %s219_s30  ;;  %p225_p13 = scmp.lt.s32.totalorder %s219_s30, %s219_s30 }
  0x1c   :  { %p226_p0 = por %p225_p13, %p224_p12 }
  0x1e   :  { %p227_p1 = pnand %p226_p0, %p220_p11 }
  0x20   :  { %230 = shalt.err (!%p227_p1)
}
  0x21   :  { %s261_s0 = smov 128   ;;  %s262_s3 = smov 8  }
  0x22   :  { %31 = dma.hbm_to_vmem [thread:$0]  %s326_s1, 1024, %s282_s12, [#allocation6], %s261_s0, %s261_s0, %s262_s3  }
  0x23   :  { %253 = dma.done.wait [#allocation3], 128  }
  0x24   :  { %254 = vsyncadd [#allocation3], 4294967168 }
  0x25   :  { %255 = dma.done.wait [#allocation6], 1024  }
  0x26   :  { %256 = vsyncadd [#allocation6], 4294966272  ;;  %v263_v0 = vmov 0.0|0.0   ;;  %vm264_vm0 = vmmov 0   ;;  %v265_v1 = vmov 0.0   ;;  %v39_v2 = vld [vmem:[#allocation5] sm:$0xff] }
  0x27   :  { %167 = vmatprep.subr.bf16.mxu0 %v263_v0  ;;  %164 = vmatprep.mubr.msk.f32.mxu0 %vm264_vm0, %v265_v1  ;;  %v40_v3 = vld [vmem:[#allocation5 + $0x8] sm:$0xff]  ;;  %v41_v4 = vld [vmem:[#allocation5 + $0x10] sm:$0xff]  ;;  %v42_v6 = vld [vmem:[#allocation5 + $0x18] sm:$0xff]  ;;  %vm47_vm1 = vcmask 523264   ;;  %s266_s1 = smov [#allocation7]  }
  0x28   :  { %v168_v5 = vpack.c.bf16 %v40_v3, %v39_v2  ;;  %v171_v7 = vpack.c.bf16 %v42_v6, %v41_v4  ;;  %v43_v8 = vld [vmem:[#allocation5 + $0x20] sm:$0xff]  ;;  %v44_v9 = vld [vmem:[#allocation5 + $0x28] sm:$0xff]  ;;  %v45_v11 = vld [vmem:[#allocation5 + $0x30] sm:$0xff]  ;;  %s128_s6 = sshll.u32 %s266_s1, 4  ;;  %s129_s6 = int_to_ptr.vmem [resolvable:$true] %s128_s6 }
  0x29   :  { %v174_v10 = vpack.c.bf16 %v44_v9, %v43_v8  ;;  %v46_v12 = vld [vmem:[#allocation5 + $0x38] sm:$0xff]  ;;  %s231_s7 = scalar_lea.vmem %s129_s6, 128  ;;  %p236_p3 = scmp.lt.s32.totalorder %s129_s6, %s129_s6 }
  0x2a   :  { %169 = vmatpush3.bf16.msra.mxu0 %v168_v5  ;;  %v177_v13 = vpack.c.bf16 %v46_v12, %v45_v11  ;;  %v38_v14 = vld [vmem:[#allocation2] sm:$0xff]  ;;  %p232_p2 = scmp.ne.s32.totalorder %s129_s6, %s231_s7  ;;  %p237_p4 = scmp.lt.s32.totalorder %s231_s7, %s231_s7 }
  0x2b   :  { %170 = vmatprep.subr.bf16.mxu0 %v263_v0 }
  0x2c   :  { %p238_p5 = por %p237_p4, %p236_p3 }
  0x2e   :  { %172 = vmatpush3.bf16.msra.mxu0 %v171_v7  ;;  %p239_p6 = pnand %p238_p5, %p232_p2 }
  0x2f   :  { %173 = vmatprep.subr.bf16.mxu0 %v263_v0 }
  0x32   :  { %175 = vmatpush3.bf16.msra.mxu0 %v174_v10 }
  0x33   :  { %176 = vmatprep.subr.bf16.mxu0 %v263_v0 }
  0x36   :  { %178 = vmatpush3.bf16.msra.mxu0 %v177_v13 }
  0x39   :  { %165 = vmatmul.mubr.msk.f32.vlgmr.msra.gmra.mrb[0].mxu0 %vm47_vm1, %v38_v14 }
 0x10c   :  { %v117_v15 = vpop.f32.mrb[0].mxu0 }
 0x10d   :  { %121 = vst.msk [vmem:[#allocation7] sm:$0xff] %vm47_vm1, %v117_v15  ;;  %v166_v16 = vpop.f32.mrb[1].mxu0 }
 0x10e   :  { %242 = shalt.err (!%p239_p6)
}
 0x10f   :  { %s243_s10 = scalar_lea.hbm %s327_s2, 128 }
 0x110   :  { %p244_p7 = scmp.ne.s32.totalorder %s327_s2, %s243_s10  ;;  %p247_p8 = scmp.lt.u32.totalorder %s243_s10, %s327_s2 }
 0x112   :  { %p249_p9 = pnand %p247_p8, %p244_p7 }
 0x114   :  { %252 = shalt.err (!%p249_p9)
}
 0x115   :  { %131 = dma.vmem_to_hbm [thread:$0]  %s129_s6, 128, %s327_s2, [#allocation4]  }
 0x116   :  { %257 = dma.done.wait [#allocation4], 128  }
 0x117   :  { %258 = vsyncadd [#allocation4], 4294967168 }
 0x118   :  { %135 = vsyncpa [#allocation3], 1 }
 0x119   :  { %136 = vsyncpa [#allocation6], 1 }
 0x11a   :  { %137 = vsyncpa [#allocation4], 1 }

</bundles_post_ra>
